<compile_context>
chip_gen: v7x
topology: tpu7x:2x2x1
jax: 0.10.0
libtpu: 0.0.40
codegen_flags: <defaults>
</compile_context>

<pallas_src>
import functools
import math

import jax
import jax.numpy as jnp
import numpy as np
from jax.experimental import pallas as pl
from jax.experimental.pallas import tpu as pltpu

EOS = 1e-10


def _theta_tail_sums(d):
    """sum_{j>=1} thetas[i][j] for p_i(x) = (x/2)^i (1-x/2)^(d-i) / B(i+1, d+1-i).

    Equals p_i(1) - p_i(0) = (d+1)*C(d,i)/2^d - (d+1 if i==0 else 0), i.e. exactly
    the scalar `generate_beta_filters` multiplies the Laplacian by.
    """
    sums = []
    for i in range(d + 1):
        p1 = (d + 1) * math.comb(d, i) / (2.0 ** d)
        p0 = (d + 1.0) if i == 0 else 0.0
        sums.append(p1 - p0)
    return sums


# ----------------------------- Pallas kernel ------------------------------- #

def _fused_forward_kernel(feat_ref, w_ref, b_ref, adj_ref, wsel_ref, bc_ref,
                          o_ref, x_ref, *, s_lp, s_hp, proj_dim):
    """One etype per grid step: projection (once) + LP/HP Laplacian filters +
    combine, all fused.  The (N, 2) output block is a VMEM accumulator.

    feat: (N, Din), w: (Din, P), b: (1, P), adj: (1, 2, N, N),
    wsel: (1, 2P, 2) per-etype combine weights, bc: (1,) SMEM bias,
    o: (N, 2) accumulator, x scratch: (N, P).
    """
    e = pl.program_id(0)

    @pl.when(e == 0)
    def _init():
        # x = relu(features @ W^T + b): computed once, held resident in VMEM
        # scratch across the (sequential) etype axis.
        x_ref[...] = jnp.maximum(
            jnp.dot(feat_ref[...], w_ref[...], preferred_element_type=jnp.float32)
            + b_ref[...], 0.0)
        o_ref[...] = jnp.zeros_like(o_ref)

    x = x_ref[...]

    def channel_emb(c, scale):                       # c=0: LP, c=1: HP
        adj = adj_ref[0, c]                           # (N, N)
        # Self-loop folded analytically: no dense eye / iota materialized.
        deg = jnp.sum(adj, axis=1, keepdims=True) + 1.0          # (N, 1)
        inv_sqrt = 1.0 / (jnp.sqrt(deg) + EOS)                   # matches reference
        dx = inv_sqrt * x                                         # D^{-1/2} x
        t = jnp.dot(adj, dx, preferred_element_type=jnp.float32) + dx  # (A+I)D^{-1/2}x
        # emb = relu(scale * L @ x),  L @ x = x - D^{-1/2}(A+I)D^{-1/2} x
        return jnp.maximum(scale * (x - inv_sqrt * t), 0.0)      # (N, P)

    wsel = wsel_ref[0]                                            # (2P, 2)
    contrib = (
        jnp.dot(channel_emb(0, s_lp), wsel[0:proj_dim, :],
                preferred_element_type=jnp.float32)
        + jnp.dot(channel_emb(1, s_hp), wsel[proj_dim:2 * proj_dim, :],
                  preferred_element_type=jnp.float32))            # (N, 2)
    o_ref[...] += contrib

    @pl.when(e == pl.num_programs(0) - 1)
    def _fin():
        o_ref[...] += bc_ref[0]                                   # linear_c bias, once


# ------------------------------ forward glue ------------------------------- #

def dual_channel_forward(features, etypes, edges_dict, weights_dict,
                         params, coeff):
    """Pallas-backed forward of Dual_Channel_Module (single fused pallas_call)."""
    W_lin, b_lin, W_c, b_c = params
    N, Din = features.shape
    P = W_lin.shape[0]
    n_et = len(etypes)
    two_p = 2 * P

    # get_adj_from_edges (glue): scatter sparse edge lists into dense adjacencies,
    # stacked (n_etypes, 2, N, N) so an etype's LP/HP matrices share one DMA stream.
    adjs = []
    for e in etypes:
        src, dst = edges_dict[e]
        _adj_lp_unused, _adj_hp_unused, w_lp, w_hp = weights_dict[e]
        adj_lp = jnp.zeros((N, N), jnp.float32).at[src, dst].set(w_lp)
        adj_hp = jnp.zeros((N, N), jnp.float32).at[src, dst].set(w_hp)
        adjs.append(jnp.stack([adj_lp, adj_hp], axis=0))
    adj2 = jnp.stack(adjs, axis=0)                      # (n_et, 2, N, N)

    # Beta-filter scalars (closed form of the sympy compute_coeff tail sums).
    sums = _theta_tail_sums(coeff)
    index = (coeff + 1) // 2
    s_lp = float(sums[index - 1])      # last LP filter scalar (flag == 1)
    s_hp = float(sums[coeff])          # last HP filter scalar (flag == 0)

    # Fold MR_Combination_Module (gather cols [0,2,4]/[1,3,5] of the concatenated
    # embeddings + linear_c weights) into a per-etype (2P, 2) weight block so the
    # kernel accumulates the final (N, 2) result directly.  Selection structure is
    # static; values come from linear_c's weights.
    sel = np.zeros((n_et, two_p, 2, 3), np.float32)
    for c_out, cols in enumerate(([0, 2, 4], [1, 3, 5])):
        for k_idx, g in enumerate(cols):
            e_idx, l = divmod(g, two_p)
            if e_idx < n_et:
                sel[e_idx, l, c_out, k_idx] = 1.0
    W_sel = jnp.einsum('elck,k->elc', jnp.asarray(sel),
                       W_c.reshape(3).astype(jnp.float32))   # (n_et, 2P, 2)

    # Explicit VMEM budget once the adjacency block outgrows the smallest default
    # scoped limit (v5e 16 MiB; v6e/v7x 32 MiB).  Cap leaves headroom; beyond that
    # the row-tiling TODO applies (v7x physical VMEM is only 64 MiB).
    block_bytes = (2 * (2 * N * N) * 4                       # adj block, double-buffered
                   + 2 * (N * Din + Din * P + P + two_p * 2 + N * 2) * 4
                   + N * P * 4)                              # x scratch
    cp_kwargs = dict(dimension_semantics=("arbitrary",))     # accumulator => sequential
    if block_bytes > (12 << 20):
        cp_kwargs["vmem_limit_bytes"] = int(min(block_bytes * 1.5 + (2 << 20), 100 << 20))

    final = pl.pallas_call(
        functools.partial(_fused_forward_kernel, s_lp=s_lp, s_hp=s_hp, proj_dim=P),
        out_shape=jax.ShapeDtypeStruct((N, 2), jnp.float32),
        grid=(n_et,),
        in_specs=[pl.BlockSpec((N, Din), lambda e: (0, 0)),
                  pl.BlockSpec((Din, P), lambda e: (0, 0)),
                  pl.BlockSpec((1, P), lambda e: (0, 0)),
                  pl.BlockSpec((1, 2, N, N), lambda e: (e, 0, 0, 0)),
                  pl.BlockSpec((1, two_p, 2), lambda e: (e, 0, 0)),
                  pl.BlockSpec(memory_space=pltpu.MemorySpace.SMEM)],
        out_specs=pl.BlockSpec((N, 2), lambda e: (0, 0)),     # same block: accumulator
        scratch_shapes=[pltpu.VMEM((N, P), jnp.float32)],      # projected features x
        compiler_params=pltpu.CompilerParams(**cp_kwargs),
    )(features, W_lin.T, b_lin.reshape(1, -1), adj2, W_sel, b_c.reshape(1))
    return final


# ---------------------------- pure-JAX reference --------------------------- #

def reference_forward(features, etypes, edges_dict, weights_dict, params, coeff):
    W_lin, b_lin, W_c, b_c = params
    N = features.shape[0]
    eye = jnp.eye(N, dtype=jnp.float32)

    x = jnp.maximum(features @ W_lin.T + b_lin, 0.0)

    sums = _theta_tail_sums(coeff)
    index = (coeff + 1) // 2
    s_lp, s_hp = sums[index - 1], sums[coeff]

    def lap(adj):
        a = adj + eye
        deg = a.sum(axis=1)
        inv = 1.0 / (jnp.sqrt(deg) + EOS)
        norm = inv[:, None] * a * inv[None, :]
        return eye - norm

    embs = []
    for e in etypes:
        src, dst = edges_dict[e]
        _, _, w_lp, w_hp = weights_dict[e]
        adj_lp = jnp.zeros((N, N), jnp.float32).at[src, dst].set(w_lp)
        adj_hp = jnp.zeros((N, N), jnp.float32).at[src, dst].set(w_hp)
        emb1 = jnp.maximum((s_lp * lap(adj_lp)) @ x, 0.0)
        emb2 = jnp.maximum((s_hp * lap(adj_hp)) @ x, 0.0)
        embs.append(jnp.concatenate([emb1, emb2], axis=1))

    combine = jnp.concatenate(embs, axis=-1)
    p1 = combine[:, jnp.array([0, 2, 4])]
    p2 = combine[:, jnp.array([1, 3, 5])]
    y1 = p1 @ W_c.T + b_c
    y2 = p2 @ W_c.T + b_c
    return jnp.concatenate([y1, y2], axis=1)


# ----------------------------------- main ----------------------------------- #

if __name__ == "__main__":
    key = jax.random.PRNGKey(0)
    N, IN_DIM, PROJ_DIM = 32, 16, 4          # nnodes, in_dim, proj_dim
    COEFF = 3                                 # Beta-filter degree (>=3 so loops run)
    E = 64                                    # edges per etype
    etypes = ("R1", "R2", "R3")

    keys = jax.random.split(key, 5 + 4 * len(etypes))

    features = jax.random.normal(keys[0], (N, IN_DIM), dtype=jnp.float32)

    # Deterministic parameter init (shapes from the module's __init__).
    W_lin = 0.1 * jax.random.normal(keys[1], (PROJ_DIM, IN_DIM), dtype=jnp.float32)
    b_lin = 0.1 * jax.random.normal(keys[2], (PROJ_DIM,), dtype=jnp.float32)
    W_c = 0.5 * jax.random.normal(keys[3], (1, 3), dtype=jnp.float32)   # linear_c
    b_c = 0.1 * jax.random.normal(keys[4], (1,), dtype=jnp.float32)
    params = (W_lin, b_lin, W_c, b_c)

    edges_dict, weights_dict = {}, {}
    for t, e in enumerate(etypes):
        k1, k2, k3 = jax.random.split(keys[5 + t], 3)
        # unique (src, dst) pairs so the adjacency scatter is well defined
        perm = jax.random.permutation(k1, N * N)[:E]
        src = (perm // N).astype(jnp.int32)
        dst = (perm % N).astype(jnp.int32)
        w_lp = jax.random.uniform(k2, (E,), dtype=jnp.float32)
        w_hp = jax.random.uniform(k3, (E,), dtype=jnp.float32)
        edges_dict[e] = (src, dst)
        # mirror weights_dict[e] = (adj_lp, adj_hp, weights_lp, weights_hp);
        # the dense adjacencies are unused in the forward, just like the original.
        weights_dict[e] = (None, None, w_lp, w_hp)

    out = dual_channel_forward(features, etypes, edges_dict, weights_dict,
                               params, COEFF)
    out = jax.block_until_ready(out)

    ref = reference_forward(features, etypes, edges_dict, weights_dict,
                            params, COEFF)

    assert out.shape == (N, 2), out.shape
    assert jnp.all(jnp.isfinite(out))
    assert jnp.allclose(out, ref, atol=1e-4, rtol=1e-4), (
        "mismatch vs reference: max abs err = "
        f"{float(jnp.max(jnp.abs(out - ref)))}")

    print("KERNEL_OK")
</pallas_src>

<mosaic_0001>
module attributes {stable_mosaic.version = 11 : i64} {
  func.func @_fused_forward_kernel(%arg0: i32, %arg1: memref<32x16xf32, #tpu.memory_space<vmem>>, %arg2: memref<16x4xf32, #tpu.memory_space<vmem>>, %arg3: memref<1x4xf32, #tpu.memory_space<vmem>>, %arg4: memref<1x2x32x32xf32, #tpu.memory_space<vmem>>, %arg5: memref<1x8x2xf32, #tpu.memory_space<vmem>>, %arg6: memref<1xf32, #tpu.memory_space<smem>>, %arg7: memref<32x2xf32, #tpu.memory_space<vmem>>, %arg8: memref<32x4xf32, #tpu.memory_space<vmem>>) attributes {dimension_semantics = [#tpu.dimension_semantics<arbitrary>], iteration_bounds = array<i64: 3>, scalar_prefetch = 0 : i64, scratch_operands = 1 : i64, tpu.core_type = #tpu.core_type<tc>, window_params = [{pipeline_mode = #tpu.pipeline_mode<synchronous>, transform_indices = @transform_0, window_bounds = array<i64: 32, 16>}, {pipeline_mode = #tpu.pipeline_mode<synchronous>, transform_indices = @transform_1, window_bounds = array<i64: 16, 4>}, {pipeline_mode = #tpu.pipeline_mode<synchronous>, transform_indices = @transform_2, window_bounds = array<i64: 1, 4>}, {transform_indices = @transform_3, window_bounds = array<i64: 1, 2, 32, 32>}, {transform_indices = @transform_4, window_bounds = array<i64: 1, 8, 2>}, {transform_indices = @transform_5, window_bounds = array<i64: 1>}, {pipeline_mode = #tpu.pipeline_mode<synchronous>, transform_indices = @transform_6, window_bounds = array<i64: 32, 2>}]} {
    %c0_i32 = arith.constant 0 : i32
    %0 = arith.cmpi eq, %arg0, %c0_i32 : i32
    %1 = arith.extui %0 : i1 to i32
    %c0_i32_0 = arith.constant 0 : i32
    %2 = arith.cmpi ne, %1, %c0_i32_0 : i32
    scf.if %2 {
      %c0_32 = arith.constant 0 : index
      %c0_33 = arith.constant 0 : index
      %61 = vector.load %arg1[%c0_32, %c0_33] : memref<32x16xf32, #tpu.memory_space<vmem>>, vector<32x16xf32>
      %c0_34 = arith.constant 0 : index
      %c0_35 = arith.constant 0 : index
      %62 = vector.load %arg2[%c0_34, %c0_35] : memref<16x4xf32, #tpu.memory_space<vmem>>, vector<16x4xf32>
      %cst_36 = arith.constant dense<0.000000e+00> : vector<32x4xf32>
      %63 = tpu.matmul %61, %62, %cst_36 {dimension_numbers = #tpu.dot_dimension_numbers<[1], [0], [0], [1], [0, 0, 1, 1], [], []>} : vector<32x16xf32>, vector<16x4xf32>, vector<32x4xf32> -> vector<32x4xf32>
      %c0_37 = arith.constant 0 : index
      %c0_38 = arith.constant 0 : index
      %64 = vector.load %arg3[%c0_37, %c0_38] : memref<1x4xf32, #tpu.memory_space<vmem>>, vector<1x4xf32>
      %65 = vector.broadcast %64 : vector<1x4xf32> to vector<32x4xf32>
      %66 = arith.addf %63, %65 : vector<32x4xf32>
      %cst_39 = arith.constant 0.000000e+00 : f32
      %67 = vector.broadcast %cst_39 : f32 to vector<32x4xf32>
      %68 = arith.maximumf %66, %67 : vector<32x4xf32>
      %c0_40 = arith.constant 0 : index
      %c0_41 = arith.constant 0 : index
      %69 = vector.load %arg8[%c0_40, %c0_41] : memref<32x4xf32, #tpu.memory_space<vmem>>, vector<32x4xf32>
      tpu.vector_store %arg8[%c0_40, %c0_41], %68 {strides = array<i32>} : memref<32x4xf32, #tpu.memory_space<vmem>>, vector<32x4xf32>,
      %cst_42 = arith.constant 0.000000e+00 : f32
      %70 = vector.broadcast %cst_42 : f32 to vector<32x2xf32>
      %c0_43 = arith.constant 0 : index
      %c0_44 = arith.constant 0 : index
      %71 = vector.load %arg7[%c0_43, %c0_44] : memref<32x2xf32, #tpu.memory_space<vmem>>, vector<32x2xf32>
      tpu.vector_store %arg7[%c0_43, %c0_44], %70 {strides = array<i32>} : memref<32x2xf32, #tpu.memory_space<vmem>>, vector<32x2xf32>,
    } else {
    }
    %c0 = arith.constant 0 : index
    %c0_1 = arith.constant 0 : index
    %3 = vector.load %arg8[%c0, %c0_1] : memref<32x4xf32, #tpu.memory_space<vmem>>, vector<32x4xf32>
    %c0_2 = arith.constant 0 : index
    %c0_3 = arith.constant 0 : index
    %c0_4 = arith.constant 0 : index
    %4 = vector.load %arg5[%c0_2, %c0_3, %c0_4] : memref<1x8x2xf32, #tpu.memory_space<vmem>>, vector<1x8x2xf32>
    %5 = vector.shape_cast %4 : vector<1x8x2xf32> to vector<8x2xf32>
    %c0_5 = arith.constant 0 : index
    %c0_6 = arith.constant 0 : index
    %c0_7 = arith.constant 0 : index
    %c0_8 = arith.constant 0 : index
    %6 = vector.load %arg4[%c0_5, %c0_6, %c0_7, %c0_8] : memref<1x2x32x32xf32, #tpu.memory_space<vmem>>, vector<1x1x32x32xf32>
    %7 = vector.shape_cast %6 : vector<1x1x32x32xf32> to vector<32x32xf32>
    %cst = arith.constant dense<0.000000e+00> : vector<32xf32>
    %8 = vector.multi_reduction <add>, %7, %cst [1] : vector<32x32xf32> to vector<32xf32>
    %9 = vector.shape_cast %8 : vector<32xf32> to vector<32x1xf32>
    %cst_9 = arith.constant 1.000000e+00 : f32
    %10 = vector.broadcast %cst_9 : f32 to vector<32x1xf32>
    %11 = arith.addf %9, %10 : vector<32x1xf32>
    %12 = math.sqrt %11 : vector<32x1xf32>
    %cst_10 = arith.constant 1.000000e-10 : f32
    %13 = vector.broadcast %cst_10 : f32 to vector<32x1xf32>
    %14 = arith.addf %12, %13 : vector<32x1xf32>
    %cst_11 = arith.constant 1.000000e+00 : f32
    %15 = vector.broadcast %cst_11 : f32 to vector<32x1xf32>
    %16 = arith.divf %15, %14 : vector<32x1xf32>
    %17 = vector.broadcast %16 : vector<32x1xf32> to vector<32x4xf32>
    %18 = arith.mulf %17, %3 : vector<32x4xf32>
    %cst_12 = arith.constant dense<0.000000e+00> : vector<32x4xf32>
    %19 = tpu.matmul %7, %18, %cst_12 {dimension_numbers = #tpu.dot_dimension_numbers<[1], [0], [0], [1], [0, 0, 1, 1], [], []>} : vector<32x32xf32>, vector<32x4xf32>, vector<32x4xf32> -> vector<32x4xf32>
    %20 = arith.addf %19, %18 : vector<32x4xf32>
    %21 = vector.broadcast %16 : vector<32x1xf32> to vector<32x4xf32>
    %22 = arith.mulf %21, %20 : vector<32x4xf32>
    %23 = arith.subf %3, %22 : vector<32x4xf32>
    %cst_13 = arith.constant 1.500000e+00 : f32
    %24 = vector.broadcast %cst_13 : f32 to vector<32x4xf32>
    %25 = arith.mulf %24, %23 : vector<32x4xf32>
    %cst_14 = arith.constant 0.000000e+00 : f32
    %26 = vector.broadcast %cst_14 : f32 to vector<32x4xf32>
    %27 = arith.maximumf %25, %26 : vector<32x4xf32>
    %28 = vector.extract_strided_slice %5 {offsets = [0, 0], sizes = [4, 2], strides = [1, 1]} : vector<8x2xf32> to vector<4x2xf32>
    %cst_15 = arith.constant dense<0.000000e+00> : vector<32x2xf32>
    %29 = tpu.matmul %27, %28, %cst_15 {dimension_numbers = #tpu.dot_dimension_numbers<[1], [0], [0], [1], [0, 0, 1, 1], [], []>} : vector<32x4xf32>, vector<4x2xf32>, vector<32x2xf32> -> vector<32x2xf32>
    %c0_16 = arith.constant 0 : index
    %c1 = arith.constant 1 : index
    %c0_17 = arith.constant 0 : index
    %c0_18 = arith.constant 0 : index
    %30 = vector.load %arg4[%c0_16, %c1, %c0_17, %c0_18] : memref<1x2x32x32xf32, #tpu.memory_space<vmem>>, vector<1x1x32x32xf32>
    %31 = vector.shape_cast %30 : vector<1x1x32x32xf32> to vector<32x32xf32>
    %cst_19 = arith.constant dense<0.000000e+00> : vector<32xf32>
    %32 = vector.multi_reduction <add>, %31, %cst_19 [1] : vector<32x32xf32> to vector<32xf32>
    %33 = vector.shape_cast %32 : vector<32xf32> to vector<32x1xf32>
    %cst_20 = arith.constant 1.000000e+00 : f32
    %34 = vector.broadcast %cst_20 : f32 to vector<32x1xf32>
    %35 = arith.addf %33, %34 : vector<32x1xf32>
    %36 = math.sqrt %35 : vector<32x1xf32>
    %cst_21 = arith.constant 1.000000e-10 : f32
    %37 = vector.broadcast %cst_21 : f32 to vector<32x1xf32>
    %38 = arith.addf %36, %37 : vector<32x1xf32>
    %cst_22 = arith.constant 1.000000e+00 : f32
    %39 = vector.broadcast %cst_22 : f32 to vector<32x1xf32>
    %40 = arith.divf %39, %38 : vector<32x1xf32>
    %41 = vector.broadcast %40 : vector<32x1xf32> to vector<32x4xf32>
    %42 = arith.mulf %41, %3 : vector<32x4xf32>
    %cst_23 = arith.constant dense<0.000000e+00> : vector<32x4xf32>
    %43 = tpu.matmul %31, %42, %cst_23 {dimension_numbers = #tpu.dot_dimension_numbers<[1], [0], [0], [1], [0, 0, 1, 1], [], []>} : vector<32x32xf32>, vector<32x4xf32>, vector<32x4xf32> -> vector<32x4xf32>
    %44 = arith.addf %43, %42 : vector<32x4xf32>
    %45 = vector.broadcast %40 : vector<32x1xf32> to vector<32x4xf32>
    %46 = arith.mulf %45, %44 : vector<32x4xf32>
    %47 = arith.subf %3, %46 : vector<32x4xf32>
    %cst_24 = arith.constant 5.000000e-01 : f32
    %48 = vector.broadcast %cst_24 : f32 to vector<32x4xf32>
    %49 = arith.mulf %48, %47 : vector<32x4xf32>
    %cst_25 = arith.constant 0.000000e+00 : f32
    %50 = vector.broadcast %cst_25 : f32 to vector<32x4xf32>
    %51 = arith.maximumf %49, %50 : vector<32x4xf32>
    %52 = vector.extract_strided_slice %5 {offsets = [4, 0], sizes = [4, 2], strides = [1, 1]} : vector<8x2xf32> to vector<4x2xf32>
    %cst_26 = arith.constant dense<0.000000e+00> : vector<32x2xf32>
    %53 = tpu.matmul %51, %52, %cst_26 {dimension_numbers = #tpu.dot_dimension_numbers<[1], [0], [0], [1], [0, 0, 1, 1], [], []>} : vector<32x4xf32>, vector<4x2xf32>, vector<32x2xf32> -> vector<32x2xf32>
    %54 = arith.addf %29, %53 : vector<32x2xf32>
    %c0_27 = arith.constant 0 : index
    %c0_28 = arith.constant 0 : index
    %55 = vector.load %arg7[%c0_27, %c0_28] : memref<32x2xf32, #tpu.memory_space<vmem>>, vector<32x2xf32>
    %56 = arith.addf %55, %54 : vector<32x2xf32>
    %c0_29 = arith.constant 0 : index
    %c0_30 = arith.constant 0 : index
    %57 = vector.load %arg7[%c0_29, %c0_30] : memref<32x2xf32, #tpu.memory_space<vmem>>, vector<32x2xf32>
    tpu.vector_store %arg7[%c0_29, %c0_30], %56 {strides = array<i32>} : memref<32x2xf32, #tpu.memory_space<vmem>>, vector<32x2xf32>,
    %c2_i32 = arith.constant 2 : i32
    %58 = arith.cmpi eq, %arg0, %c2_i32 : i32
    %59 = arith.extui %58 : i1 to i32
    %c0_i32_31 = arith.constant 0 : i32
    %60 = arith.cmpi ne, %59, %c0_i32_31 : i32
    scf.if %60 {
      %c0_32 = arith.constant 0 : index
      %c0_33 = arith.constant 0 : index
      %61 = vector.load %arg7[%c0_32, %c0_33] : memref<32x2xf32, #tpu.memory_space<vmem>>, vector<32x2xf32>
      %c0_34 = arith.constant 0 : index
      %62 = memref.load %arg6[%c0_34] : memref<1xf32, #tpu.memory_space<smem>>
      %63 = vector.broadcast %62 : f32 to vector<32x2xf32>
      %64 = arith.addf %61, %63 : vector<32x2xf32>
      %c0_35 = arith.constant 0 : index
      %c0_36 = arith.constant 0 : index
      %65 = vector.load %arg7[%c0_35, %c0_36] : memref<32x2xf32, #tpu.memory_space<vmem>>, vector<32x2xf32>
      tpu.vector_store %arg7[%c0_35, %c0_36], %64 {strides = array<i32>} : memref<32x2xf32, #tpu.memory_space<vmem>>, vector<32x2xf32>,
    } else {
    }
    return
  }
  func.func @transform_0(%arg0: i32) -> (i32, i32) {
    %c0_i32 = arith.constant 0 : i32
    %c0_i32_0 = arith.constant 0 : i32
    %c0_i32_1 = arith.constant 0 : i32
    return %c0_i32, %c0_i32_0 : i32, i32
  }
  func.func @transform_1(%arg0: i32) -> (i32, i32) {
    %c0_i32 = arith.constant 0 : i32
    %c0_i32_0 = arith.constant 0 : i32
    %c0_i32_1 = arith.constant 0 : i32
    return %c0_i32, %c0_i32_0 : i32, i32
  }
  func.func @transform_2(%arg0: i32) -> (i32, i32) {
    %c0_i32 = arith.constant 0 : i32
    %c0_i32_0 = arith.constant 0 : i32
    %c0_i32_1 = arith.constant 0 : i32
    return %c0_i32, %c0_i32_0 : i32, i32
  }
  func.func @transform_3(%arg0: i32) -> (i32, i32, i32, i32) {
    %c0_i32 = arith.constant 0 : i32
    %c0_i32_0 = arith.constant 0 : i32
    %c0_i32_1 = arith.constant 0 : i32
    %c0_i32_2 = arith.constant 0 : i32
    return %arg0, %c0_i32, %c0_i32_0, %c0_i32_1 : i32, i32, i32, i32
  }
  func.func @transform_4(%arg0: i32) -> (i32, i32, i32) {
    %c0_i32 = arith.constant 0 : i32
    %c0_i32_0 = arith.constant 0 : i32
    %c0_i32_1 = arith.constant 0 : i32
    return %arg0, %c0_i32, %c0_i32_0 : i32, i32, i32
  }
  func.func @transform_5(%arg0: i32) -> i32 {
    %c0_i32 = arith.constant 0 : i32
    %c0_i32_0 = arith.constant 0 : i32
    return %c0_i32 : i32
  }
  func.func @transform_6(%arg0: i32) -> (i32, i32) {
    %c0_i32 = arith.constant 0 : i32
    %c0_i32_0 = arith.constant 0 : i32
    %c0_i32_1 = arith.constant 0 : i32
    return %c0_i32, %c0_i32_0 : i32, i32
  }
}

</mosaic_0001>

<bundles_post_ra>
// kernel: tpu_custom_call.1
= control target key start
LH: loop header
LB: loop body
LE: loop exit
PB: predicated region body
PF: predicated region fallthrough
CT: control target
= control target key end

     0   :  { %s1709_s0 = inlined_call_operand.vmem [shape: f32[32,16], index: 0, kind: input, shape index: {}]   ;;  %s1710_s1 = inlined_call_operand.vmem [shape: f32[16,4], index: 1, kind: input, shape index: {}]   ;;  %s1711_s2 = inlined_call_operand.vmem [shape: f32[1,4], index: 2, kind: input, shape index: {}]   ;;  %s1712_s3 = inlined_call_operand.hbm [shape: f32[3,2,32,32], index: 3, kind: input, shape index: {}]   ;;  %s1713_s4 = inlined_call_operand.vmem [shape: f32[3,8,2], index: 4, kind: input, shape index: {}]   ;;  %s1714_s5 = inlined_call_operand.<no memory space> [shape: f32[1], index: 5, kind: input, shape index: {}]   ;;  %s1715_s6 = inlined_call_operand.vmem [shape: f32[32,2], index: 6, kind: output, shape index: {}]  }
   0x1   :  { %11 = sst [smem:[#allocation3]] %s1714_s5 }
   0x2   :  { %12 = vsyncpa [#allocation5], 0 }
   0x3   :  { %14 = vsyncpa [#allocation5 + $0x1], 0  ;;  %s1384_s23 = smov 0   ;;  %s1386_s24 = smov 0  }
   0x4   :  { %s1388_s25 = smov 0   ;;  %s1390_s26 = smov 0  }
   0x5 LB: > { %s1403_s5 = sadd.s32 4294967295, %s1340_s26   ;;  %s1406_s27 = sadd.s32 1, %s1340_s26   ;;  %s1340_s26 = sphi %s1390_s26, %s1722_s26   ;;  %s1336_s25 = sphi %s1388_s25, %s1721_s25   ;;  %s1332_s24 = sphi %s1386_s24, %s1720_s24   ;;  %s1328_s23 = sphi %s1384_s23, %s1719_s23  }
   0x6   : > { %s87_s28 = ssub.s32 %s1340_s26, %s1406_s27  ;;  %s90_s29 = sadd.s32 1, %s1336_s25 }
   0x7   : > { %p88_p0 = scmp.eq.s32.totalorder %s87_s28, 0  ;;  %p97_p1 = scmp.ne.s32.totalorder %s1336_s25, %s1332_s24 }
   0x8   : > { %p98_p2 = scmp.eq.s32.totalorder %s1340_s26, 0  ;;  %p103_p3 = scmp.ne.s32.totalorder %s1332_s24, %s1328_s23 }
   0x9   : > { %s1416_s30 = scalar_select %p88_p0, %s1336_s25, %s90_s29  }
   0xa   : > { %p99_p4 = por %p98_p2, %p97_p1  ;;  %p104_p5 = scmp.eq.s32.totalorder %s1403_s5, 0 }
   0xb   : > { %p1208_p6 = scmp.lt.s32.totalorder %s1340_s26, 3  ;;  %s207_s8 = sand.u32 1, %s1336_s25  }
   0xc   : > { %p1420_p7 = por %p104_p5, %p103_p3  ;;  %s1052_s9 = sshll.u32 %s207_s8, 6 }
   0xd   : > { %s1089_s10 = sshll.u32 %s1340_s26, 10  ;;  %s211_s14 = scalar_lea.vmem [#allocation4], %s1052_s9 }
   0xe   : > { %s1429_s13 = scalar_lea.hbm %s1712_s3, %s1089_s10  ;;  %s218_s15 = sshll.u32 %s211_s14, 4  ;;  %s1431_s15 = int_to_ptr.vmem [resolvable:$true] %s218_s15 }
   0xf   : > { %p1433_p8 = pnand %p1208_p6, %p99_p4  ;;  %s1438_s17 = scalar_lea.sflag [#allocation5], %s207_s8 }
  0x10   : > { %s1276_s18 = scalar_lea.hbm %s1429_s13, 1024  ;;  %s1281_s21 = scalar_lea.hbm %s1712_s3, 3072 }
  0x11   : > { %p1277_p10 = scmp.ne.s32.totalorder %s1429_s13, %s1276_s18  ;;  %p1278_p11 = pneg %p1433_p8 }
  0x12   : > { %p1282_p0 = scmp.lt.u32.totalorder %s1429_s13, %s1712_s3  ;;  %p1283_p1 = scmp.lt.u32.totalorder %s1281_s21, %s1276_s18 }
  0x13   : > { %p1279_p12 = pnand %p1278_p11, %p1277_p10  ;;  %p1285_p3 = scmp.lt.u32.totalorder %s1276_s18, %s1429_s13 }
  0x14   : > { %p1284_p2 = por %p1283_p1, %p1282_p0 }
  0x15   : > { %p1280_p13 = pneg %p1279_p12 }
  0x16   : > { %p1286_p4 = por %p1285_p3, %p1284_p2 }
  0x18   : > { %p1287_p5 = pnand %p1286_p4, %p1280_p13 }
  0x1a   : > { %1290 = shalt.err (!%p1287_p5)
}
  0x1b   : > { %s1291_s28 = scalar_lea.vmem %s1431_s15, 1024  ;;  %s1342_s29 = smov [#allocation4]  }
  0x1c   : > { %p1292_p6 = scmp.ne.s32.totalorder %s1431_s15, %s1291_s28  ;;  %s1296_s8 = sshll.u32 %s1342_s29, 4  ;;  %s1297_s8 = int_to_ptr.vmem [resolvable:$false] %s1296_s8 }
  0x1d   : > { %s1298_s9 = scalar_lea.vmem %s1297_s8, 2048  ;;  %p1299_p9 = scmp.lt.s32.totalorder %s1431_s15, %s1297_s8 }
  0x1e   : > { %p1294_p10 = pnand %p1292_p6, %p1278_p11  ;;  %p1300_p0 = scmp.lt.s32.totalorder %s1298_s9, %s1291_s28 }
  0x20   : > { %p1295_p12 = pneg %p1294_p10  ;;  %p1301_p1 = por %p1300_p0, %p1299_p9 }
  0x22   : > { %p1302_p2 = pnand %p1301_p1, %p1295_p12 }
  0x24   : > { %1305 = shalt.err (!%p1302_p2)
}
  0x25   : > { %s1343_s10 = smov 128   ;;  %s1344_s11 = smov 8  }
  0x26   : > { %1207 = dma.hbm_to_vmem [thread:$0]  (!%p1433_p8), %s1429_s13, 1024, %s1431_s15, %s1438_s17, %s1343_s10, %s1343_s10, %s1344_s11  }
  0x27   : > { %p233_p11 = scmp.lt.s32.totalorder %s1340_s26, 4  ;;  %p1718_p13 = scmp.ge.s32.totalorder %s1340_s26, 1 }
  0x29   : > { %p234_p3 = pnand %p1718_p13, %p233_p11 }
  0x2a   : > { %s239_s12 = sand.u32 (!%p234_p3), 1, %s1332_s24  }
  0x2b   : > { %237 = sbr.rel (%p234_p3) target bundleno = 939 (0x3ab), region = 44  ;;  %s1056_s14 = sshll.u32 (!%p234_p3), %s239_s12, 6 }
  0x2c   : > { %s240_s18 = scalar_lea.sflag (!%p234_p3), [#allocation5], %s239_s12  ;;  %s1470_s19 = scalar_lea.vmem (!%p234_p3), [#allocation4], %s1056_s14 }
  0x32   : > { %1323 = dma.done.wait (%p1420_p7), %s240_s18, 1024  }
  0x33   : > { %1325 = vsyncadd (%p1420_p7), %s240_s18, 4294966272  ;;  %p271_p9 = scmp.lt.s32.totalorder %s1403_s5, 2  ;;  %p1058_p8 = scmp.ne.s32.totalorder %s1403_s5, 0 }
  0x34   : > { %v283_v0 = vld [vmem:[%s1710_s1] sm:$0xff] (!%p1058_p8)  ;;  %v284_v1 = vld [vmem:[%s1710_s1 + $0x8] sm:$0xff] (!%p1058_p8)  ;;  %vm292_vm0 = vcmask (!%p1058_p8), 130048   ;;  %v281_v4 = vld [vmem:[%s1709_s0 + $0x10] sm:$0xff] (!%p1058_p8)  ;;  %vm399_vm1 = vcmask (!%p1058_p8), 15360   ;;  %v1345_v7 = vmov (!%p1058_p8), 0.0  }
  0x35   : > { %s272_s13 = scalar_select %p271_p9, %s1403_s5, 2 }
  0x36   : > { %278 = sbr.rel (%p1058_p8) target bundleno = 278 (0x116), region = 52  ;;  %v279_v2 = vld [vmem:[%s1709_s0] sm:$0xff] (!%p1058_p8)  ;;  %v1176_v3 = vpack.c.bf16 (!%p1058_p8), %v284_v1, %v283_v0  ;;  %1129 = vmatprep.mubr.msk.f32.mxu1 (!%p1058_p8), %vm292_vm0, %v281_v4  ;;  %v280_v5 = vld [vmem:[%s1709_s0 + $0x8] sm:$0xff] (!%p1058_p8)  ;;  %v282_v6 = vld [vmem:[%s1709_s0 + $0x18] sm:$0xff] (!%p1058_p8)  ;;  %400 = vst.msk [vmem:[%s1715_s6] sm:$0xff] (!%p1058_p8), %vm399_vm1, %v1345_v7  ;;  %vm394_vm2 = vcmask (!%p1058_p8), 31744  }
  0x37   : > { %s1057_s15 = sshll.u32 %s272_s13, 3  ;;  %1126 = vmatprep.mubr.msk.f32.mxu0 (!%p1058_p8), %vm292_vm0, %v279_v2  ;;  %401 = vst.msk [vmem:[%s1715_s6 + $0x8] sm:$0xff] (!%p1058_p8), %vm399_vm1, %v1345_v7  ;;  %402 = vst.msk [vmem:[%s1715_s6 + $0x10] sm:$0xff] (!%p1058_p8), %vm399_vm1, %v1345_v7  ;;  %v1059_v8 = vld [vmem:[%s1711_s2] ss:$0 sm:$0xff] (!%p1058_p8) }
  0x38   : > { %s1481_s17 = scalar_lea.vmem %s1713_s4, %s1057_s15  ;;  %1177 = vmatprep.subr.bf16.mxu0 (!%p1058_p8), %v1176_v3  ;;  %1196 = vmatprep.subr.bf16.mxu1 (!%p1058_p8), %v1176_v3  ;;  %403 = vst.msk [vmem:[%s1715_s6 + $0x18] sm:$0xff] (!%p1058_p8), %vm399_vm1, %v1345_v7 }
  0x39   : > { %1179 = vmatpush3.bf16.msra.mxu0 (!%p1058_p8), %v1176_v3  ;;  %1197 = vmatpush3.bf16.msra.mxu1 (!%p1058_p8), %v1176_v3 }
  0x3c   : > { %1127 = vmatmul.mubr.msk.f32.vlgmr.msra.gmra.mrb[0].mxu0 (!%p1058_p8), %vm292_vm0, %v280_v5  ;;  %1130 = vmatmul.mubr.msk.f32.vlgmr.msra.gmra.mrb[0].mxu1 (!%p1058_p8), %vm292_vm0, %v282_v6 }
 0x10f   : > { %v1128_v9 = vpop.f32.mrb[0].mxu0  ;;  %v1131_v10 = vpop.f32.mrb[0].mxu1 }
 0x110   : > { %v377_v11 = vadd.f32 %v1128_v9, %v1059_v8  ;;  %v387_v12 = vadd.f32 %v1131_v10, %v1059_v8  ;;  %v371_v13 = vpop.f32.mrb[1].mxu0  ;;  %v381_v14 = vpop.f32.mrb[1].mxu1 }
 0x111   : > { %v372_v15 = vadd.f32 %v1059_v8, %v371_v13  ;;  %v382_v16 = vadd.f32 %v1059_v8, %v381_v14 }
 0x112   : > { %v391_v17 = vmax.f32 %v377_v11, 0.0  ;;  %v393_v18 = vmax.f32 %v387_v12, 0.0 }
 0x113   : > { %v390_v19 = vmax.f32 %v372_v15, 0.0  ;;  %v392_v20 = vmax.f32 %v382_v16, 0.0 }
 0x114   : > { %396 = vst.msk [vmem:[#allocation2 + $0x8] sm:$0xff] %vm394_vm2, %v391_v17  ;;  %398 = vst.msk [vmem:[#allocation2 + $0x18] sm:$0xff] %vm394_vm2, %v393_v18 }
 0x115   : > { %395 = vst.msk [vmem:[#allocation2] sm:$0xff] %vm394_vm2, %v390_v19  ;;  %397 = vst.msk [vmem:[#allocation2 + $0x10] sm:$0xff] %vm394_vm2, %v392_v20 }
 0x116 PF: > { %v1518_v21 = vld [vmem:[%s1470_s19 + $0x10] sm:$0xff]  ;;  %vm413_vm3 = vcmask 261120   ;;  %v409_v22 = vld [vmem:[%s1470_s19] sm:$0xff]  ;;  %v1522_v23 = vld [vmem:[%s1470_s19 + $0x18] sm:$0xff]  ;;  %p1086_p7 = scmp.ne.s32.totalorder %s1403_s5, 2 }
 0x117   : > { %v420_v24 = vsel %vm413_vm3, %v1518_v21, 0.0  ;;  %v414_v25 = vsel %vm413_vm3, %v409_v22, 0.0  ;;  %v1528_v26 = vld [vmem:[%s1470_s19 + $0x8] sm:$0xff]  ;;  %1140 = vmatprep.mubr.msk.f32.mxu1 %vm413_vm3, %v409_v22  ;;  %v423_v27 = vsel %vm413_vm3, %v1522_v23, 0.0  ;;  %v1539_v30 = vld [vmem:[%s1470_s19 + $0x20] sm:$0xff]  ;;  %v1546_v33 = vld [vmem:[%s1470_s19 + $0x38] sm:$0xff] }
 0x118   : > { %421 = vadd.xlane.f32.xlu1 %v420_v24  ;;  %415 = vadd.xlane.f32.xlu0 %v414_v25  ;;  %v417_v28 = vsel %vm413_vm3, %v1528_v26, 0.0  ;;  %v1536_v29 = vld [vmem:[%s1470_s19 + $0x28] sm:$0xff]  ;;  %v592_v32 = vsel %vm413_vm3, %v1539_v30, 0.0  ;;  %v1549_v34 = vld [vmem:[%s1470_s19 + $0x30] sm:$0xff]  ;;  %v601_v35 = vsel %vm413_vm3, %v1546_v33, 0.0  ;;  %s988_s20 = sld [smem:[#allocation3]] (!%p1086_p7) }
 0x119   : > { %v595_v31 = vsel %vm413_vm3, %v1536_v29, 0.0  ;;  %v598_v36 = vsel %vm413_vm3, %v1549_v34, 0.0 }
 0x11c   : > { %424 = vadd.xlane.f32.xlu1 %v423_v27  ;;  %418 = vadd.xlane.f32.xlu0 %v417_v28 }
 0x120   : > { %596 = vadd.xlane.f32.xlu1 %v595_v31  ;;  %593 = vadd.xlane.f32.xlu0 %v592_v32 }
 0x124   : > { %602 = vadd.xlane.f32.xlu1 %v601_v35  ;;  %599 = vadd.xlane.f32.xlu0 %v598_v36 }
 0x1a5   : > { %v422_v37 = vpop.xlane.xlu1 %421  ;;  %v416_v38 = vpop.xlane.xlu0 %415 }
 0x1a6   : > { %v428_v39 = vadd.f32 1.0, %v422_v37  ;;  %v426_v40 = vadd.f32 1.0, %v416_v38 }
 0x1a8   : > { %1244 = vrsqrt.f32 %v428_v39  ;;  %vm446_vm4 = vcmp.eq.f32.partialorder %v428_v39, inf  ;;  %vm448_vm5 = vcmp.eq.f32.partialorder %v428_v39, 0.0  ;;  %v449_v56 = vand.u32 2147483648, %v428_v39 }
 0x1a9   : > { %1246 = vrsqrt.f32 %v426_v40  ;;  %v425_v41 = vpop.xlane.xlu1 %424  ;;  %v419_v42 = vpop.xlane.xlu0 %418  ;;  %vm432_vm6 = vcmp.eq.f32.partialorder %v426_v40, inf  ;;  %v435_v59 = vand.u32 2147483648, %v426_v40  ;;  %vm434_vm7 = vcmp.eq.f32.partialorder %v426_v40, 0.0 }
 0x1aa   : > { %v429_v43 = vadd.f32 1.0, %v425_v41  ;;  %v427_v44 = vadd.f32 1.0, %v419_v42 }
 0x1ac   : > { %1248 = vrsqrt.f32 %v429_v43  ;;  %vm453_vm8 = vcmp.eq.f32.partialorder %v429_v43, inf  ;;  %vm455_vm9 = vcmp.eq.f32.partialorder %v429_v43, 0.0  ;;  %v456_v3 = vand.u32 2147483648, %v429_v43 }
 0x1ad   : > { %1250 = vrsqrt.f32 %v427_v44  ;;  %v597_v45 = vpop.xlane.xlu1 %596  ;;  %v594_v46 = vpop.xlane.xlu0 %593  ;;  %vm439_vm10 = vcmp.eq.f32.partialorder %v427_v44, inf  ;;  %v442_v7 = vand.u32 2147483648, %v427_v44  ;;  %vm441_vm11 = vcmp.eq.f32.partialorder %v427_v44, 0.0 }
 0x1ae   : > { %v605_v47 = vadd.f32 1.0, %v597_v45  ;;  %v1555_v48 = vadd.f32 1.0, %v594_v46  ;;  %v1582_v46 = vld [vmem:[#allocation2] sm:$0xff] }
 0x1b0   : > { %1252 = vrsqrt.f32 %v605_v47  ;;  %vm617_vm12 = vcmp.eq.f32.partialorder %v605_v47, inf  ;;  %vm619_vm13 = vcmp.eq.f32.partialorder %v605_v47, 0.0  ;;  %v620_v15 = vand.u32 2147483648, %v605_v47 }
 0x1b1   : > { %1254 = vrsqrt.f32 %v1555_v48  ;;  %v603_v49 = vpop.xlane.xlu1 %602  ;;  %v600_v50 = vpop.xlane.xlu0 %599  ;;  %vm610_vm14 = vcmp.eq.f32.partialorder %v1555_v48, inf  ;;  %v613_v19 = vand.u32 2147483648, %v1555_v48  ;;  %vm612_vm15 = vcmp.eq.f32.partialorder %v1555_v48, 0.0 }
 0x1b2   : > { %v1245_v51 = vpop.eup %1244  ;;  %v1558_v52 = vadd.f32 1.0, %v603_v49  ;;  %v1560_v53 = vadd.f32 1.0, %v600_v50 }
 0x1b3   : > { %v1247_v54 = vpop.eup %1246  ;;  %v445_v55 = vmul.f32 %v1245_v51, %v428_v39  ;;  %v1590_v51 = vld [vmem:[#allocation2 + $0x10] sm:$0xff] }
 0x1b4   : > { %v431_v57 = vmul.f32 %v1247_v54, %v426_v40  ;;  %1256 = vrsqrt.f32 %v1558_v52  ;;  %vm631_vm0 = vcmp.eq.f32.partialorder %v1558_v52, inf  ;;  %vm633_vm1 = vcmp.eq.f32.partialorder %v1558_v52, 0.0 }
 0x1b5   : > { %v447_v58 = vsel %vm446_vm4, %v428_v39, %v445_v55  ;;  %1258 = vrsqrt.f32 %v1560_v53  ;;  %v634_v32 = vand.u32 2147483648, %v1558_v52  ;;  %vm624_vm2 = vcmp.eq.f32.partialorder %v1560_v53, inf }
 0x1b6   : > { %v1249_v60 = vpop.eup %1248  ;;  %v433_v61 = vsel %vm432_vm6, %v426_v40, %v431_v57  ;;  %v450_v62 = vsel %vm448_vm5, %v449_v56, %v447_v58  ;;  %v627_v38 = vand.u32 2147483648, %v1560_v53  ;;  %vm626_vm4 = vcmp.eq.f32.partialorder %v1560_v53, 0.0 }
 0x1b7   : > { %v1251_v63 = vpop.eup %1250  ;;  %v452_v0 = vmul.f32 %v1249_v60, %v429_v43  ;;  %v436_v1 = vsel %vm434_vm7, %v435_v59, %v433_v61  ;;  %v460_v2 = vadd.f32 1e-10, %v450_v62  ;;  %vm780_vm5 = vcmask 1043456  }
 0x1b8   : > { %v438_v4 = vmul.f32 %v1251_v63, %v427_v44  ;;  %v458_v5 = vadd.f32 1e-10, %v436_v1  ;;  %vm975_vm6 = vcmask 15360  }
 0x1b9   : > { %v454_v6 = vsel %vm453_vm8, %v429_v43, %v452_v0  ;;  %1260 = vrcp.f32 %v460_v2 }
 0x1ba   : > { %v1253_v8 = vpop.eup %1252  ;;  %v440_v9 = vsel %vm439_vm10, %v427_v44, %v438_v4  ;;  %v457_v10 = vsel %vm455_vm9, %v456_v3, %v454_v6  ;;  %1262 = vrcp.f32 %v458_v5 }
 0x1bb   : > { %v1255_v11 = vpop.eup %1254  ;;  %v616_v12 = vmul.f32 %v1253_v8, %v605_v47  ;;  %v443_v13 = vsel %vm441_vm11, %v442_v7, %v440_v9  ;;  %v461_v14 = vadd.f32 1e-10, %v457_v10 }
 0x1bc   : > { %v609_v16 = vmul.f32 %v1255_v11, %v1555_v48  ;;  %v459_v17 = vadd.f32 1e-10, %v443_v13 }
 0x1bd   : > { %v618_v18 = vsel %vm617_vm12, %v605_v47, %v616_v12  ;;  %1264 = vrcp.f32 %v461_v14  ;;  %v1584_v47 = vld [vmem:[#allocation2 + $0x8] sm:$0xff] }
 0x1be   : > { %v1257_v20 = vpop.eup %1256  ;;  %v611_v22 = vsel %vm610_vm14, %v1555_v48, %v609_v16  ;;  %1266 = vrcp.f32 %v459_v17  ;;  %v621_v24 = vsel %vm619_vm13, %v620_v15, %v618_v18  ;;  %v1586_v48 = vld [vmem:[#allocation2 + $0x18] sm:$0xff] }
 0x1bf   : > { %v1259_v25 = vpop.eup %1258  ;;  %v630_v27 = vmul.f32 %v1257_v20, %v1558_v52  ;;  %v614_v28 = vsel %vm612_vm15, %v613_v19, %v611_v22  ;;  %v637_v31 = vadd.f32 1e-10, %v621_v24 }
 0x1c0   : > { %v623_v35 = vmul.f32 %v1259_v25, %v1560_v53  ;;  %v636_v36 = vadd.f32 1e-10, %v614_v28 }
 0x1c1   : > { %v632_v37 = vsel %vm631_vm0, %v1558_v52, %v630_v27  ;;  %1268 = vrcp.f32 %v637_v31 }
 0x1c2   : > { %v625_v39 = vsel %vm624_vm2, %v1560_v53, %v623_v35  ;;  %1270 = vrcp.f32 %v636_v36  ;;  %v635_v40 = vsel %vm633_vm1, %v634_v32, %v632_v37 }
 0x1c3   : > { %v628_v41 = vsel %vm626_vm4, %v627_v38, %v625_v39  ;;  %v639_v42 = vadd.f32 1e-10, %v635_v40  ;;  %v1580_v44 = vpop.eup %1260 }
 0x1c4   : > { %v638_v43 = vadd.f32 1e-10, %v628_v41  ;;  %v1263_v45 = vpop.eup %1262  ;;  %v472_v57 = vmul.f32 %v1580_v44, %v1590_v51 }
 0x1c5   : > { %1272 = vrcp.f32 %v639_v42  ;;  %v470_v52 = vmul.f32 %v1263_v45, %v1582_v46 }
 0x1c6   : > { %1274 = vrcp.f32 %v638_v43 }
 0x1c7   : > { %v1588_v49 = vpop.eup %1264 }
 0x1c8   : > { %v1267_v50 = vpop.eup %1266  ;;  %v473_v54 = vmul.f32 %v1588_v49, %v1586_v48 }
 0x1c9   : > { %v471_v53 = vmul.f32 %v1267_v50, %v1584_v47 }
 0x1ca   : > { %v1184_v59 = vpack.c.bf16 %v473_v54, %v472_v57 }
 0x1cb   : > { %v1269_v55 = vpop.eup %1268  ;;  %v1180_v56 = vpack.c.bf16 %v471_v53, %v470_v52 }
 0x1cc   : > { %v1271_v58 = vpop.eup %1270  ;;  %v649_v61 = vmul.f32 %v1269_v55, %v1584_v47 }
 0x1cd   : > { %1181 = vmatprep.subr.bf16.mxu1 %v1180_v56  ;;  %v648_v60 = vmul.f32 %v1271_v58, %v1582_v46 }
 0x1ce   : > { %1183 = vmatpush3.bf16.msra.mxu1 %v1180_v56 }
 0x1cf   : > { %v1273_v62 = vpop.eup %1272  ;;  %1185 = vmatprep.subr.bf16.mxu1 %v1184_v59  ;;  %v1188_v0 = vpack.c.bf16 %v649_v61, %v648_v60 }
 0x1d0   : > { %v1275_v63 = vpop.eup %1274  ;;  %v651_v2 = vmul.f32 %v1273_v62, %v1586_v48 }
 0x1d1   : > { %v650_v1 = vmul.f32 %v1275_v63, %v1590_v51 }
 0x1d2   : > { %1187 = vmatpush3.bf16.msra.mxu1 %v1184_v59 }
 0x1d3   : > { %1189 = vmatprep.subr.bf16.mxu1 %v1188_v0  ;;  %v1192_v3 = vpack.c.bf16 %v651_v2, %v650_v1 }
 0x1d5   : > { %1141 = vmatmul.mubr.msk.f32.vlgmr.msra.gmra.mrb[0].mxu1 %vm413_vm3, %v1528_v26  ;;  %v408_v26 = vld [vmem:[%s1481_s17] sm:$0xff] }
 0x1d6   : > { %1191 = vmatpush3.bf16.msra.mxu1 %v1188_v0  ;;  %1143 = vmatprep.mubr.msk.f32.mxu1 %vm413_vm3, %v1518_v21  ;;  %v766_v4 = vrot.slane %v408_v26, 4 }
 0x1d7   : > { %1193 = vmatprep.subr.bf16.mxu1 %v1192_v3 }
 0x1d8   : > { %1160 = vmatprep.subr.msk.mxu0 %vm780_vm5, %v766_v4 }
 0x1d9   : > { %1144 = vmatmul.mubr.msk.f32.gmra.mrb[2].mxu1 %vm413_vm3, %v1522_v23  ;;  %1161 = vmatpush3.msk.msra.mxu0 %vm780_vm5, %v766_v4 }
 0x1da   : > { %1195 = vmatpush3.bf16.msra.mxu1 %v1192_v3  ;;  %1154 = vmatprep.mubr.msk.f32.mxu1 %vm413_vm3, %v1539_v30 }
 0x1db   : > { %1168 = vmatprep.subr.msk.mxu0 %vm780_vm5, %v408_v26 }
 0x1dd   : > { %1155 = vmatmul.mubr.msk.f32.vlgmr.msra.gmra.mrb[4].mxu1 %vm413_vm3, %v1536_v29 }
 0x1de   : > { %1157 = vmatprep.mubr.msk.f32.mxu1 %vm413_vm3, %v1549_v34 }
 0x1e1   : > { %1158 = vmatmul.mubr.msk.f32.gmra.mrb[6].mxu1 %vm413_vm3, %v1546_v33  ;;  %vm767_vm3 = vcmask 31744  }
 0x2a8   : > { %v1142_v21 = vpop.f32.mrb[0].mxu1 }
 0x2a9   : > { %v552_v23 = vpop.f32.mrb[1].mxu1  ;;  %v558_v9 = vadd.f32 %v1142_v21, %v471_v53  ;;  %v989_v21 = vstv (!%p1086_p7), %s988_s20 }
 0x2aa   : > { %v553_v29 = vadd.f32 %v552_v23, %v470_v52 }
 0x2ab   : > { %v572_v19 = vmul.f32 %v1267_v50, %v558_v9 }
 0x2ac   : > { %v1145_v30 = vpop.f32.mrb[2].mxu1  ;;  %v571_v10 = vmul.f32 %v1263_v45, %v553_v29 }
 0x2ad   : > { %v562_v5 = vpop.f32.mrb[3].mxu1  ;;  %v568_v20 = vadd.f32 %v1145_v30, %v473_v54  ;;  %v576_v37 = vsub.f32 %v1584_v47, %v572_v19 }
 0x2ae   : > { %v563_v11 = vadd.f32 %v562_v5, %v472_v57  ;;  %v575_v25 = vsub.f32 %v1582_v46, %v571_v10 }
 0x2af   : > { %v574_v38 = vmul.f32 %v1588_v49, %v568_v20  ;;  %v580_v45 = vmul.f32 1.5, %v576_v37 }
 0x2b0   : > { %v1156_v6 = vpop.f32.mrb[4].mxu1  ;;  %v573_v27 = vmul.f32 %v1580_v44, %v563_v11  ;;  %v579_v41 = vmul.f32 1.5, %v575_v25 }
 0x2b1   : > { %v736_v7 = vadd.f32 %v1156_v6, %v649_v61  ;;  %v730_v34 = vpop.f32.mrb[5].mxu1  ;;  %v584_v49 = vmax.f32 %v580_v45, 0.0  ;;  %v969_v61 = vld [vmem:[%s1715_s6 + $0x10] sm:$0xff] }
 0x2b2   : > { %v731_v8 = vadd.f32 %v730_v34, %v648_v60  ;;  %v577_v42 = vsub.f32 %v1590_v51, %v573_v27  ;;  %v970_v60 = vld [vmem:[%s1715_s6 + $0x18] sm:$0xff] }
 0x2b3   : > { %v750_v33 = vmul.f32 %v1269_v55, %v736_v7  ;;  %v967_v55 = vld [vmem:[%s1715_s6] sm:$0xff] }
 0x2b4   : > { %v749_v12 = vmul.f32 %v1271_v58, %v731_v8  ;;  %v1159_v13 = vpop.f32.mrb[6].mxu1  ;;  %v581_v52 = vmul.f32 1.5, %v577_v42 }
 0x2b5   : > { %v754_v14 = vsub.f32 %v1584_v47, %v750_v33  ;;  %v746_v15 = vadd.f32 %v1159_v13, %v651_v2  ;;  %v740_v16 = vpop.f32.mrb[7].mxu1  ;;  %v583_v47 = vmax.f32 %v579_v41, 0.0 }
 0x2b6   : > { %v741_v17 = vadd.f32 %v740_v16, %v650_v1  ;;  %v753_v18 = vsub.f32 %v1582_v46, %v749_v12  ;;  %v578_v46 = vsub.f32 %v1586_v48, %v574_v38  ;;  %v585_v53 = vmax.f32 %v581_v52, 0.0 }
 0x2b7   : > { %v758_v22 = vmul.f32 0.5, %v754_v14  ;;  %v752_v24 = vmul.f32 %v1273_v62, %v746_v15 }
 0x2b8   : > { %v751_v28 = vmul.f32 %v1275_v63, %v741_v17  ;;  %v757_v31 = vmul.f32 0.5, %v753_v18 }
 0x2b9   : > { %v756_v32 = vsub.f32 %v1586_v48, %v752_v24  ;;  %v762_v39 = vmax.f32 %v758_v22, 0.0  ;;  %v968_v48 = vld [vmem:[%s1715_s6 + $0x8] sm:$0xff] }
 0x2ba   : > { %v755_v35 = vsub.f32 %v1590_v51, %v751_v28  ;;  %v761_v36 = vmax.f32 %v757_v31, 0.0  ;;  %v582_v51 = vmul.f32 1.5, %v578_v46 }
 0x2bb   : > { %v760_v40 = vmul.f32 0.5, %v756_v32 }
 0x2bc   : > { %v759_v43 = vmul.f32 0.5, %v755_v35  ;;  %1162 = vmatprep.mubr.msk.f32.mxu0 %vm767_vm3, %v761_v36  ;;  %v586_v54 = vmax.f32 %v582_v51, 0.0 }
 0x2bd   : > { %1163 = vmatmul.mubr.msk.f32.vlgmr.msra.gmra.mrb[0].mxu0 %vm767_vm3, %v762_v39  ;;  %v764_v50 = vmax.f32 %v760_v40, 0.0 }
 0x2be   : > { %v763_v44 = vmax.f32 %v759_v43, 0.0  ;;  %1169 = vmatpush3.msk.msra.mxu0 %vm780_vm5, %v408_v26 }
 0x2c0   : > { %1165 = vmatprep.mubr.msk.f32.mxu0 %vm767_vm3, %v763_v44 }
 0x2c1   : > { %1166 = vmatmul.mubr.msk.f32.gmra.mrb[2].mxu0 %vm767_vm3, %v764_v50 }
 0x2c2   : > { %1170 = vmatprep.mubr.msk.f32.mxu0 %vm767_vm3, %v583_v47 }
 0x2c5   : > { %1171 = vmatmul.mubr.msk.f32.vlgmr.msra.gmra.mrb[0].mxu0 %vm767_vm3, %v584_v49 }
 0x2c6   : > { %1173 = vmatprep.mubr.msk.f32.mxu0 %vm767_vm3, %v585_v53 }
 0x2c9   : > { %1174 = vmatmul.mubr.msk.f32.gmra.mrb[2].mxu0 %vm767_vm3, %v586_v54 }
 0x398   : > { %v1172_v56 = vpop.f32.mrb[0].mxu0 }
 0x399   : > { %v972_v57 = vadd.f32 %v1172_v56, %v968_v48  ;;  %v948_v58 = vpop.f32.mrb[1].mxu0 }
 0x39a   : > { %v971_v59 = vadd.f32 %v967_v55, %v948_v58  ;;  %983 = sbr.rel (%p1086_p7) target bundleno = 939 (0x3ab), region = 56 }
 0x39b   : > { %977 = vst.msk [vmem:[%s1715_s6 + $0x8] sm:$0xff] %vm975_vm6, %v972_v57 }
 0x39c   : > { %976 = vst.msk [vmem:[%s1715_s6] sm:$0xff] %vm975_vm6, %v971_v59  ;;  %v1175_v62 = vpop.f32.mrb[2].mxu0 }
 0x39d   : > { %v974_v63 = vadd.f32 %v1175_v62, %v970_v60  ;;  %v958_v0 = vpop.f32.mrb[3].mxu0 }
 0x39e   : > { %v973_v1 = vadd.f32 %v969_v61, %v958_v0 }
 0x39f   : > { %979 = vst.msk [vmem:[%s1715_s6 + $0x18] sm:$0xff] %vm975_vm6, %v974_v63 }
 0x3a0   : > { %978 = vst.msk [vmem:[%s1715_s6 + $0x10] sm:$0xff] %vm975_vm6, %v973_v1 }
 0x3a2   : > { %v985_v3 = vld [vmem:[%s1715_s6 + $0x8] sm:$0xff] }
 0x3a3   : > { %v984_v2 = vld [vmem:[%s1715_s6] sm:$0xff]  ;;  %v991_v30 = vadd.f32 %v989_v21, %v985_v3 }
 0x3a4   : > { %v990_v23 = vadd.f32 %v989_v21, %v984_v2 }
 0x3a5   : > { %995 = vst.msk [vmem:[%s1715_s6 + $0x8] sm:$0xff] %vm975_vm6, %v991_v30 }
 0x3a6   : > { %v987_v4 = vld [vmem:[%s1715_s6 + $0x18] sm:$0xff]  ;;  %994 = vst.msk [vmem:[%s1715_s6] sm:$0xff] %vm975_vm6, %v990_v23 }
 0x3a7   : > { %v986_v26 = vld [vmem:[%s1715_s6 + $0x10] sm:$0xff]  ;;  %v993_v29 = vadd.f32 %v989_v21, %v987_v4 }
 0x3a8   : > { %v992_v5 = vadd.f32 %v989_v21, %v986_v26 }
 0x3a9   : > { %997 = vst.msk [vmem:[%s1715_s6 + $0x18] sm:$0xff] %vm975_vm6, %v993_v29 }
 0x3aa   : > { %996 = vst.msk [vmem:[%s1715_s6 + $0x10] sm:$0xff] %vm975_vm6, %v992_v5 }
 0x3ab PF: > { %p17_p4 = scmp.ge.s32.totalorder %s1406_s27, 5   ;;  %s1719_s23 = smov %s1332_s24 }
 0x3ac   : > { %s1720_s24 = smov %s1336_s25  ;;  %s1721_s25 = smov %s1416_s30 }
 0x3ad   : > { %s1722_s26 = smov %s1406_s27  ;;  %19 = sbr.rel (!%p17_p4) target bundleno = 5 (0x5), region = 92 }
 0x3b4   :  { %1009 = vsyncpa [#allocation5], 1 }
 0x3b5   :  { %1011 = vsyncpa [#allocation5 + $0x1], 1 }

</bundles_post_ra>
